<compile_context>
chip_gen: v5e
topology: v5e:2x2
jax: 0.10.0
libtpu: 0.0.40
codegen_flags: <defaults>
</compile_context>

<pallas_src>
import functools

import jax
import jax.numpy as jnp
from jax import lax
from jax.experimental import pallas as pl
from jax.experimental.pallas import tpu as pltpu

EPS = 1e-5


# ------------------------------ Pallas kernel ------------------------------ #

def _shift_rows(x, delta):
    """result[r] = x[r - delta] with zero fill at the vacated rows (static delta)."""
    rows, cols = x.shape
    pad = jnp.zeros((abs(delta), cols), x.dtype)
    if delta > 0:
        return jnp.concatenate([pad, x[: rows - delta, :]], axis=0)
    return jnp.concatenate([x[-delta:, :], pad], axis=0)


def _bottleneck_kernel(x_ref, w1_ref, w2_ref, w3_ref,
                       b1_ref, b2_ref, b3_ref,
                       o_ref, *, H, W, Cin, P, Cout):
    """Fully fused bottleneck for one batch element (block = (1, H, W, C)).

    BN scales are pre-folded into the bf16 weights; the refs b*_ref hold the
    fused BN biases (f32).  Accumulation and epilogue are f32.
    """
    rows = H * W
    x = x_ref[...].reshape(rows, Cin)                       # f32; also the residual

    # ---- conv1 (1x1, bn1-scaled weights) + bias + relu ----------------------
    h1 = jnp.dot(x.astype(jnp.bfloat16), w1_ref[...],
                 preferred_element_type=jnp.float32)
    h1 = jnp.maximum(h1 + b1_ref[...], 0.0)                 # (rows, P) f32

    # ---- conv2 (3x3, pad=1, bn2-scaled weights) + bias + relu ---------------
    # kw taps: sublane shift by +/-1 with per-row mask for image-row wrap,
    # then lane-concat -> one (rows, 3P) operand (contraction dim 3P).
    # kh taps: shift the f32 partial sums by +/-W rows; zero fill at the image
    # top/bottom comes for free from _shift_rows, so no extra masks.
    w_idx = lax.broadcasted_iota(jnp.int32, (rows, 1), 0) % W
    xs_l = jnp.where(w_idx >= 1,     _shift_rows(h1, 1),  0.0)   # x[h, w-1]
    xs_r = jnp.where(w_idx <= W - 2, _shift_rows(h1, -1), 0.0)   # x[h, w+1]
    x3 = jnp.concatenate([xs_l, h1, xs_r], axis=-1).astype(jnp.bfloat16)   # (rows, 3P)

    z_top = jnp.dot(x3, w2_ref[0], preferred_element_type=jnp.float32)  # kh=0 (dh=-1)
    z_mid = jnp.dot(x3, w2_ref[1], preferred_element_type=jnp.float32)  # kh=1 (dh= 0)
    z_bot = jnp.dot(x3, w2_ref[2], preferred_element_type=jnp.float32)  # kh=2 (dh=+1)

    acc2 = z_mid + _shift_rows(z_top, W) + _shift_rows(z_bot, -W)
    h2 = jnp.maximum(acc2 + b2_ref[...], 0.0)               # (rows, P) f32

    # ---- conv3 (1x1, bn3-scaled weights) + bias + residual + relu -----------
    h3 = jnp.dot(h2.astype(jnp.bfloat16), w3_ref[...],
                 preferred_element_type=jnp.float32)
    out = jnp.maximum(h3 + b3_ref[...] + x, 0.0)
    o_ref[...] = out.reshape(1, H, W, Cout).astype(o_ref.dtype)


# -------------------------------- Wrappers ---------------------------------- #

def _fuse_bn(bn):
    gamma, beta, mean, var = bn
    scale = gamma / jnp.sqrt(var + EPS)
    bias = beta - mean * scale
    return scale, bias


def bottleneck_forward_nhwc(x_nhwc, params):
    """Fused Bottleneck forward, NHWC in / NHWC out (native layout for chaining)."""
    N, H, W, Cin = x_nhwc.shape
    P = params["w1_io"].shape[1]
    Cout = params["w3_io"].shape[1]
    if Cin != Cout:
        # TODO(synk): stride>1 and the downsample branch are not implemented.
        raise NotImplementedError(
            "Bottleneck kernel requires stride=1, downsample=None "
            "(inplanes == planes * expansion).")

    s1, b1 = _fuse_bn(params["bn1"])
    s2, b2 = _fuse_bn(params["bn2"])
    s3, b3 = _fuse_bn(params["bn3"])

    # Fold BN scale into the (per-output-channel) weight columns, cast to bf16
    # for the MXU.  Bias-add + relu stays in-kernel in f32.
    w1 = (params["w1_io"] * s1[None, :]).astype(jnp.bfloat16)          # (Cin, P)
    w2 = (params["w2_k3"] * s2[None, None, :]).astype(jnp.bfloat16)    # (3, 3P, P)
    w3 = (params["w3_io"] * s3[None, :]).astype(jnp.bfloat16)          # (P, Cout)

    kernel = functools.partial(_bottleneck_kernel,
                               H=H, W=W, Cin=Cin, P=P, Cout=Cout)

    def _const(shape):
        # Constant index map -> block is fetched once and stays VMEM-resident.
        return pl.BlockSpec(shape, lambda n, _nd=len(shape): (0,) * _nd)

    out = pl.pallas_call(
        kernel,
        out_shape=jax.ShapeDtypeStruct((N, H, W, Cout), jnp.float32),
        grid=(N,),
        in_specs=[
            pl.BlockSpec((1, H, W, Cin), lambda n: (n, 0, 0, 0)),   # x (f32)
            _const((Cin, P)),                      # w1 * s1 (bf16)
            _const((3, 3 * P, P)),                 # w2 * s2 packed over (kw, ci) (bf16)
            _const((P, Cout)),                     # w3 * s3 (bf16)
            _const((1, P)),                        # bn1 fused bias (f32)
            _const((1, P)),                        # bn2 fused bias
            _const((1, Cout)),                     # bn3 fused bias
        ],
        out_specs=pl.BlockSpec((1, H, W, Cout), lambda n: (n, 0, 0, 0)),
        compiler_params=pltpu.CompilerParams(
            dimension_semantics=("parallel",),          # batch -> megacore + pipeline
            vmem_limit_bytes=64 * 1024 * 1024),
    )(x_nhwc, w1, w2, w3,
      b1.reshape(1, P), b2.reshape(1, P), b3.reshape(1, Cout))
    return out


def bottleneck_forward(x_nchw, params):
    """PyTorch-convention (NCHW) boundary wrapper.

    When chaining many blocks keep activations NHWC and call
    `bottleneck_forward_nhwc` directly so no per-block transposes are paid.
    """
    x = jnp.transpose(x_nchw, (0, 2, 3, 1))          # NCHW -> NHWC
    out = bottleneck_forward_nhwc(x, params)
    return jnp.transpose(out, (0, 3, 1, 2))          # NHWC -> NCHW


# ----------------------- Pure-JAX reference (NCHW, f32) --------------------- #

def _ref_forward(x, params):
    def conv(h, w_oihw, pad):
        return lax.conv_general_dilated(
            h, w_oihw, (1, 1), [(pad, pad), (pad, pad)],
            dimension_numbers=("NCHW", "OIHW", "NCHW"))

    def bn(h, p):
        g, b, m, v = p
        s = g / jnp.sqrt(v + EPS)
        return h * s[None, :, None, None] + (b - m * s)[None, :, None, None]

    out = jax.nn.relu(bn(conv(x, params["w1_oihw"], 0), params["bn1"]))
    out = jax.nn.relu(bn(conv(out, params["w2_oihw"], 1), params["bn2"]))
    out = bn(conv(out, params["w3_oihw"], 0), params["bn3"])
    return jax.nn.relu(out + x)


# ------------------------------- Param init --------------------------------- #

def init_params(key, inplanes, planes, expansion=4):
    ks = jax.random.split(key, 6)
    w1 = 0.1 * jax.random.normal(ks[0], (planes, inplanes, 1, 1), jnp.float32)          # OIHW
    w2 = 0.1 * jax.random.normal(ks[1], (planes, planes, 3, 3), jnp.float32)
    w3 = 0.1 * jax.random.normal(ks[2], (planes * expansion, planes, 1, 1), jnp.float32)

    def bn_params(k, c):
        k1, k2, k3, k4 = jax.random.split(k, 4)
        gamma = 1.0 + 0.1 * jax.random.normal(k1, (c,), jnp.float32)
        beta = 0.1 * jax.random.normal(k2, (c,), jnp.float32)
        mean = 0.1 * jax.random.normal(k3, (c,), jnp.float32)
        var = jnp.abs(jax.random.normal(k4, (c,), jnp.float32)) + 0.5
        return (gamma, beta, mean, var)

    w2_hwio = jnp.transpose(w2, (2, 3, 1, 0))                 # (kh, kw, Cin, Cout)
    return {
        # f32 OIHW forms (reference)
        "w1_oihw": w1, "w2_oihw": w2, "w3_oihw": w3,
        # f32 packed kernel forms (BN-scale folded + bf16-cast in the wrapper)
        "w1_io": jnp.transpose(w1[:, :, 0, 0], (1, 0)),               # (Cin, P)
        "w2_k3": w2_hwio.reshape(3, 3 * planes, planes),              # (3, 3P, P)
        "w3_io": jnp.transpose(w3[:, :, 0, 0], (1, 0)),               # (P, 4P)
        "bn1": bn_params(ks[3], planes),
        "bn2": bn_params(ks[4], planes),
        "bn3": bn_params(ks[5], planes * expansion),
    }


# ---------------------------------- Main ------------------------------------ #

if __name__ == "__main__":
    key = jax.random.PRNGKey(0)
    k_x, k_p = jax.random.split(key)

    N, inplanes, planes, H, W = 2, 128, 32, 8, 8    # inplanes == planes * expansion
    x = jax.random.normal(k_x, (N, inplanes, H, W), jnp.float32)
    params = init_params(k_p, inplanes, planes)

    out = jax.block_until_ready(bottleneck_forward(x, params))
    ref = jax.block_until_ready(_ref_forward(x, params))

    assert out.shape == ref.shape == (N, planes * 4, H, W)
    max_err = float(jnp.max(jnp.abs(out - ref)))
    # bf16 MXU operands vs. f32 reference -> a few percent tolerance expected.
    assert jnp.allclose(out, ref, atol=1e-1, rtol=5e-2), f"max abs err = {max_err}"

    print("KERNEL_OK")
</pallas_src>

<mosaic_0001>
module attributes {stable_mosaic.version = 11 : i64} {
  func.func @_bottleneck_kernel(%arg0: i32, %arg1: memref<1x8x8x128xf32, #tpu.memory_space<vmem>>, %arg2: memref<128x32xbf16, #tpu.memory_space<vmem>>, %arg3: memref<3x96x32xbf16, #tpu.memory_space<vmem>>, %arg4: memref<32x128xbf16, #tpu.memory_space<vmem>>, %arg5: memref<1x32xf32, #tpu.memory_space<vmem>>, %arg6: memref<1x32xf32, #tpu.memory_space<vmem>>, %arg7: memref<1x128xf32, #tpu.memory_space<vmem>>, %arg8: memref<1x8x8x128xf32, #tpu.memory_space<vmem>>) attributes {dimension_semantics = [#tpu.dimension_semantics<parallel>], iteration_bounds = array<i64: 2>, scalar_prefetch = 0 : i64, scratch_operands = 0 : i64, tpu.core_type = #tpu.core_type<tc>, window_params = [{transform_indices = @transform_0, window_bounds = array<i64: 1, 8, 8, 128>}, {pipeline_mode = #tpu.pipeline_mode<synchronous>, transform_indices = @transform_1, window_bounds = array<i64: 128, 32>}, {pipeline_mode = #tpu.pipeline_mode<synchronous>, transform_indices = @transform_2, window_bounds = array<i64: 3, 96, 32>}, {pipeline_mode = #tpu.pipeline_mode<synchronous>, transform_indices = @transform_3, window_bounds = array<i64: 32, 128>}, {pipeline_mode = #tpu.pipeline_mode<synchronous>, transform_indices = @transform_4, window_bounds = array<i64: 1, 32>}, {pipeline_mode = #tpu.pipeline_mode<synchronous>, transform_indices = @transform_5, window_bounds = array<i64: 1, 32>}, {pipeline_mode = #tpu.pipeline_mode<synchronous>, transform_indices = @transform_6, window_bounds = array<i64: 1, 128>}, {transform_indices = @transform_7, window_bounds = array<i64: 1, 8, 8, 128>}]} {
    %c0 = arith.constant 0 : index
    %c0_0 = arith.constant 0 : index
    %c0_1 = arith.constant 0 : index
    %c0_2 = arith.constant 0 : index
    %0 = vector.load %arg1[%c0, %c0_0, %c0_1, %c0_2] : memref<1x8x8x128xf32, #tpu.memory_space<vmem>>, vector<1x8x8x128xf32>
    %1 = vector.shape_cast %0 : vector<1x8x8x128xf32> to vector<64x128xf32>
    %2 = arith.truncf %1 : vector<64x128xf32> to vector<64x128xbf16>
    %c0_3 = arith.constant 0 : index
    %c0_4 = arith.constant 0 : index
    %3 = vector.load %arg2[%c0_3, %c0_4] : memref<128x32xbf16, #tpu.memory_space<vmem>>, vector<128x32xbf16>
    %cst = arith.constant dense<0.000000e+00> : vector<64x32xf32>
    %4 = tpu.matmul %2, %3, %cst {dimension_numbers = #tpu.dot_dimension_numbers<[1], [0], [0], [1], [0, 0, 1, 1], [], []>} : vector<64x128xbf16>, vector<128x32xbf16>, vector<64x32xf32> -> vector<64x32xf32>
    %c0_5 = arith.constant 0 : index
    %c0_6 = arith.constant 0 : index
    %5 = vector.load %arg5[%c0_5, %c0_6] : memref<1x32xf32, #tpu.memory_space<vmem>>, vector<1x32xf32>
    %6 = vector.broadcast %5 : vector<1x32xf32> to vector<64x32xf32>
    %7 = arith.addf %4, %6 : vector<64x32xf32>
    %cst_7 = arith.constant 0.000000e+00 : f32
    %8 = vector.broadcast %cst_7 : f32 to vector<64x32xf32>
    %9 = arith.maximumf %7, %8 : vector<64x32xf32>
    %10 = tpu.iota {dimensions = array<i32: 0>} : vector<64x1xi32>
    %c8_i32 = arith.constant 8 : i32
    %c0_i32 = arith.constant 0 : i32
    %11 = arith.cmpi eq, %c8_i32, %c0_i32 : i32
    %c1_i32 = arith.constant 1 : i32
    %12 = arith.select %11, %c1_i32, %c8_i32 : i32
    %13 = vector.broadcast %12 : i32 to vector<64x1xi32>
    %14 = arith.remsi %10, %13 : vector<64x1xi32>
    %c0_i32_8 = arith.constant 0 : i32
    %15 = vector.broadcast %c0_i32_8 : i32 to vector<64x1xi32>
    %16 = arith.cmpi ne, %14, %15 : vector<64x1xi32>
    %c0_i32_9 = arith.constant 0 : i32
    %17 = vector.broadcast %c0_i32_9 : i32 to vector<64x1xi32>
    %18 = arith.cmpi slt, %14, %17 : vector<64x1xi32>
    %c0_i32_10 = arith.constant 0 : i32
    %19 = arith.cmpi slt, %12, %c0_i32_10 : i32
    %20 = vector.broadcast %19 : i1 to vector<64x1xi1>
    %21 = vector.broadcast %20 : vector<64x1xi1> to vector<64x1xi1>
    %22 = arith.xori %18, %21 : vector<64x1xi1>
    %23 = arith.andi %22, %16 : vector<64x1xi1>
    %24 = vector.broadcast %12 : i32 to vector<64x1xi32>
    %25 = arith.addi %14, %24 : vector<64x1xi32>
    %26 = arith.select %23, %25, %14 : vector<64x1xi1>, vector<64x1xi32>
    %c1_i32_11 = arith.constant 1 : i32
    %27 = vector.broadcast %c1_i32_11 : i32 to vector<64x1xi32>
    %28 = arith.cmpi sge, %26, %27 : vector<64x1xi32>
    %cst_12 = arith.constant 0.000000e+00 : f32
    %29 = vector.broadcast %cst_12 : f32 to vector<1x32xf32>
    %30 = vector.extract_strided_slice %9 {offsets = [0, 0], sizes = [63, 32], strides = [1, 1]} : vector<64x32xf32> to vector<63x32xf32>
    %31 = tpu.concatenate %29, %30 in 0 : vector<1x32xf32>, vector<63x32xf32> -> vector<64x32xf32>
    %cst_13 = arith.constant 0.000000e+00 : f32
    %32 = vector.shape_cast %28 : vector<64x1xi1> to vector<64x1xi1>
    %33 = vector.broadcast %32 : vector<64x1xi1> to vector<64x32xi1>
    %34 = vector.broadcast %cst_13 : f32 to vector<64x32xf32>
    %35 = arith.select %33, %31, %34 : vector<64x32xi1>, vector<64x32xf32>
    %c6_i32 = arith.constant 6 : i32
    %36 = vector.broadcast %c6_i32 : i32 to vector<64x1xi32>
    %37 = arith.cmpi sle, %26, %36 : vector<64x1xi32>
    %cst_14 = arith.constant 0.000000e+00 : f32
    %38 = vector.broadcast %cst_14 : f32 to vector<1x32xf32>
    %39 = vector.extract_strided_slice %9 {offsets = [1, 0], sizes = [63, 32], strides = [1, 1]} : vector<64x32xf32> to vector<63x32xf32>
    %40 = tpu.concatenate %39, %38 in 0 : vector<63x32xf32>, vector<1x32xf32> -> vector<64x32xf32>
    %cst_15 = arith.constant 0.000000e+00 : f32
    %41 = vector.shape_cast %37 : vector<64x1xi1> to vector<64x1xi1>
    %42 = vector.broadcast %41 : vector<64x1xi1> to vector<64x32xi1>
    %43 = vector.broadcast %cst_15 : f32 to vector<64x32xf32>
    %44 = arith.select %42, %40, %43 : vector<64x32xi1>, vector<64x32xf32>
    %45 = tpu.concatenate %35, %9, %44 in 1 : vector<64x32xf32>, vector<64x32xf32>, vector<64x32xf32> -> vector<64x96xf32>
    %46 = arith.truncf %45 : vector<64x96xf32> to vector<64x96xbf16>
    %c0_16 = arith.constant 0 : index
    %c0_17 = arith.constant 0 : index
    %c0_18 = arith.constant 0 : index
    %47 = vector.load %arg3[%c0_16, %c0_17, %c0_18] : memref<3x96x32xbf16, #tpu.memory_space<vmem>>, vector<1x96x32xbf16>
    %48 = vector.shape_cast %47 : vector<1x96x32xbf16> to vector<96x32xbf16>
    %cst_19 = arith.constant dense<0.000000e+00> : vector<64x32xf32>
    %49 = tpu.matmul %46, %48, %cst_19 {dimension_numbers = #tpu.dot_dimension_numbers<[1], [0], [0], [1], [0, 0, 1, 1], [], []>} : vector<64x96xbf16>, vector<96x32xbf16>, vector<64x32xf32> -> vector<64x32xf32>
    %c1 = arith.constant 1 : index
    %c0_20 = arith.constant 0 : index
    %c0_21 = arith.constant 0 : index
    %50 = vector.load %arg3[%c1, %c0_20, %c0_21] : memref<3x96x32xbf16, #tpu.memory_space<vmem>>, vector<1x96x32xbf16>
    %51 = vector.shape_cast %50 : vector<1x96x32xbf16> to vector<96x32xbf16>
    %cst_22 = arith.constant dense<0.000000e+00> : vector<64x32xf32>
    %52 = tpu.matmul %46, %51, %cst_22 {dimension_numbers = #tpu.dot_dimension_numbers<[1], [0], [0], [1], [0, 0, 1, 1], [], []>} : vector<64x96xbf16>, vector<96x32xbf16>, vector<64x32xf32> -> vector<64x32xf32>
    %c2 = arith.constant 2 : index
    %c0_23 = arith.constant 0 : index
    %c0_24 = arith.constant 0 : index
    %53 = vector.load %arg3[%c2, %c0_23, %c0_24] : memref<3x96x32xbf16, #tpu.memory_space<vmem>>, vector<1x96x32xbf16>
    %54 = vector.shape_cast %53 : vector<1x96x32xbf16> to vector<96x32xbf16>
    %cst_25 = arith.constant dense<0.000000e+00> : vector<64x32xf32>
    %55 = tpu.matmul %46, %54, %cst_25 {dimension_numbers = #tpu.dot_dimension_numbers<[1], [0], [0], [1], [0, 0, 1, 1], [], []>} : vector<64x96xbf16>, vector<96x32xbf16>, vector<64x32xf32> -> vector<64x32xf32>
    %cst_26 = arith.constant 0.000000e+00 : f32
    %56 = vector.broadcast %cst_26 : f32 to vector<8x32xf32>
    %57 = vector.extract_strided_slice %49 {offsets = [0, 0], sizes = [56, 32], strides = [1, 1]} : vector<64x32xf32> to vector<56x32xf32>
    %58 = tpu.concatenate %56, %57 in 0 : vector<8x32xf32>, vector<56x32xf32> -> vector<64x32xf32>
    %59 = arith.addf %52, %58 : vector<64x32xf32>
    %cst_27 = arith.constant 0.000000e+00 : f32
    %60 = vector.broadcast %cst_27 : f32 to vector<8x32xf32>
    %61 = vector.extract_strided_slice %55 {offsets = [8, 0], sizes = [56, 32], strides = [1, 1]} : vector<64x32xf32> to vector<56x32xf32>
    %62 = tpu.concatenate %61, %60 in 0 : vector<56x32xf32>, vector<8x32xf32> -> vector<64x32xf32>
    %63 = arith.addf %59, %62 : vector<64x32xf32>
    %c0_28 = arith.constant 0 : index
    %c0_29 = arith.constant 0 : index
    %64 = vector.load %arg6[%c0_28, %c0_29] : memref<1x32xf32, #tpu.memory_space<vmem>>, vector<1x32xf32>
    %65 = vector.broadcast %64 : vector<1x32xf32> to vector<64x32xf32>
    %66 = arith.addf %63, %65 : vector<64x32xf32>
    %cst_30 = arith.constant 0.000000e+00 : f32
    %67 = vector.broadcast %cst_30 : f32 to vector<64x32xf32>
    %68 = arith.maximumf %66, %67 : vector<64x32xf32>
    %69 = arith.truncf %68 : vector<64x32xf32> to vector<64x32xbf16>
    %c0_31 = arith.constant 0 : index
    %c0_32 = arith.constant 0 : index
    %70 = vector.load %arg4[%c0_31, %c0_32] : memref<32x128xbf16, #tpu.memory_space<vmem>>, vector<32x128xbf16>
    %cst_33 = arith.constant dense<0.000000e+00> : vector<64x128xf32>
    %71 = tpu.matmul %69, %70, %cst_33 {dimension_numbers = #tpu.dot_dimension_numbers<[1], [0], [0], [1], [0, 0, 1, 1], [], []>} : vector<64x32xbf16>, vector<32x128xbf16>, vector<64x128xf32> -> vector<64x128xf32>
    %c0_34 = arith.constant 0 : index
    %c0_35 = arith.constant 0 : index
    %72 = vector.load %arg7[%c0_34, %c0_35] : memref<1x128xf32, #tpu.memory_space<vmem>>, vector<1x128xf32>
    %73 = vector.broadcast %72 : vector<1x128xf32> to vector<64x128xf32>
    %74 = arith.addf %71, %73 : vector<64x128xf32>
    %75 = arith.addf %74, %1 : vector<64x128xf32>
    %cst_36 = arith.constant 0.000000e+00 : f32
    %76 = vector.broadcast %cst_36 : f32 to vector<64x128xf32>
    %77 = arith.maximumf %75, %76 : vector<64x128xf32>
    %78 = vector.shape_cast %77 : vector<64x128xf32> to vector<1x8x8x128xf32>
    %c0_37 = arith.constant 0 : index
    %c0_38 = arith.constant 0 : index
    %c0_39 = arith.constant 0 : index
    %c0_40 = arith.constant 0 : index
    %79 = vector.load %arg8[%c0_37, %c0_38, %c0_39, %c0_40] : memref<1x8x8x128xf32, #tpu.memory_space<vmem>>, vector<1x8x8x128xf32>
    tpu.vector_store %arg8[%c0_37, %c0_38, %c0_39, %c0_40], %78 {strides = array<i32>} : memref<1x8x8x128xf32, #tpu.memory_space<vmem>>, vector<1x8x8x128xf32>,
    return
  }
  func.func @transform_0(%arg0: i32) -> (i32, i32, i32, i32) {
    %c0_i32 = arith.constant 0 : i32
    %c0_i32_0 = arith.constant 0 : i32
    %c0_i32_1 = arith.constant 0 : i32
    %c0_i32_2 = arith.constant 0 : i32
    return %arg0, %c0_i32, %c0_i32_0, %c0_i32_1 : i32, i32, i32, i32
  }
  func.func @transform_1(%arg0: i32) -> (i32, i32) {
    %c0_i32 = arith.constant 0 : i32
    %c0_i32_0 = arith.constant 0 : i32
    %c0_i32_1 = arith.constant 0 : i32
    return %c0_i32, %c0_i32_0 : i32, i32
  }
  func.func @transform_2(%arg0: i32) -> (i32, i32, i32) {
    %c0_i32 = arith.constant 0 : i32
    %c0_i32_0 = arith.constant 0 : i32
    %c0_i32_1 = arith.constant 0 : i32
    %c0_i32_2 = arith.constant 0 : i32
    return %c0_i32, %c0_i32_0, %c0_i32_1 : i32, i32, i32
  }
  func.func @transform_3(%arg0: i32) -> (i32, i32) {
    %c0_i32 = arith.constant 0 : i32
    %c0_i32_0 = arith.constant 0 : i32
    %c0_i32_1 = arith.constant 0 : i32
    return %c0_i32, %c0_i32_0 : i32, i32
  }
  func.func @transform_4(%arg0: i32) -> (i32, i32) {
    %c0_i32 = arith.constant 0 : i32
    %c0_i32_0 = arith.constant 0 : i32
    %c0_i32_1 = arith.constant 0 : i32
    return %c0_i32, %c0_i32_0 : i32, i32
  }
  func.func @transform_5(%arg0: i32) -> (i32, i32) {
    %c0_i32 = arith.constant 0 : i32
    %c0_i32_0 = arith.constant 0 : i32
    %c0_i32_1 = arith.constant 0 : i32
    return %c0_i32, %c0_i32_0 : i32, i32
  }
  func.func @transform_6(%arg0: i32) -> (i32, i32) {
    %c0_i32 = arith.constant 0 : i32
    %c0_i32_0 = arith.constant 0 : i32
    %c0_i32_1 = arith.constant 0 : i32
    return %c0_i32, %c0_i32_0 : i32, i32
  }
  func.func @transform_7(%arg0: i32) -> (i32, i32, i32, i32) {
    %c0_i32 = arith.constant 0 : i32
    %c0_i32_0 = arith.constant 0 : i32
    %c0_i32_1 = arith.constant 0 : i32
    %c0_i32_2 = arith.constant 0 : i32
    return %arg0, %c0_i32, %c0_i32_0, %c0_i32_1 : i32, i32, i32, i32
  }
}

</mosaic_0001>

<bundles_post_ra>
// kernel: tpu_custom_call.1
= control target key start
LH: loop header
LB: loop body
LE: loop exit
PB: predicated region body
PF: predicated region fallthrough
CT: control target
= control target key end

     0   :  { %12 = vsyncpa [#allocation3], 0  ;;  %s1986_s0 = inlined_call_operand.vmem [shape: f32[2,8,8,128], index: 0, kind: input, shape index: {}]   ;;  %s1987_s1 = inlined_call_operand.vmem [shape: bf16[128,32], index: 1, kind: input, shape index: {}]   ;;  %s1988_s2 = inlined_call_operand.vmem [shape: bf16[3,96,32], index: 2, kind: input, shape index: {}]   ;;  %s1989_s3 = inlined_call_operand.vmem [shape: bf16[32,128], index: 3, kind: input, shape index: {}]   ;;  %s1990_s4 = inlined_call_operand.vmem [shape: f32[1,32], index: 4, kind: input, shape index: {}]   ;;  %s1991_s5 = inlined_call_operand.vmem [shape: f32[1,32], index: 5, kind: input, shape index: {}]   ;;  %s1992_s6 = inlined_call_operand.vmem [shape: f32[1,128], index: 6, kind: input, shape index: {}]   ;;  %s1993_s7 = inlined_call_operand.hbm [shape: f32[2,8,8,128], index: 7, kind: output, shape index: {}]  }
   0x1   :  { %14 = vsyncpa [#allocation3 + $0x1], 0  ;;  %s1539_s24 = smov 0   ;;  %s1541_s25 = smov 0  }
   0x2   :  { %s1543_s26 = smov 0   ;;  %s1545_s27 = smov 0  }
   0x3 LB: > { %s1560_s28 = sadd.s32 4294967295, %s1493_s27   ;;  %s1139_s29 = sadd.s32 4294967294, %s1493_s27   ;;  %s1493_s27 = sphi %s1545_s27, %s2019_s27   ;;  %s1489_s26 = sphi %s1543_s26, %s2018_s26   ;;  %s1485_s25 = sphi %s1541_s25, %s2017_s25   ;;  %s1481_s24 = sphi %s1539_s24, %s2016_s24  }
   0x4   : > { %s1564_s30 = sadd.s32 1, %s1493_s27   ;;  %s179_s8 = sadd.s32 1, %s1489_s26 }
   0x5   : > { %s176_s9 = ssub.s32 %s1493_s27, %s1564_s30  ;;  %p189_p0 = scmp.ne.s32.totalorder %s1489_s26, %s1485_s25 }
   0x6   : > { %p177_p1 = scmp.eq.s32.totalorder %s176_s9, 0  ;;  %p190_p2 = scmp.eq.s32.totalorder %s1560_s28, 1 }
   0x7   : > { %p195_p3 = scmp.ne.s32.totalorder %s1485_s25, %s1481_s24  ;;  %p196_p4 = scmp.eq.s32.totalorder %s1139_s29, 1 }
   0x8   : > { %s1575_s10 = scalar_select %p177_p1, %s1489_s26, %s179_s8  }
   0x9   : > { %p1577_p5 = por %p190_p2, %p189_p0  ;;  %p1581_p6 = por %p196_p4, %p195_p3 }
   0xa   : > { %p1142_p7 = scmp.ge.s32.totalorder %s1493_s27, 1  ;;  %p240_p8 = scmp.lt.s32.totalorder %s1493_s27, 3 }
   0xc   : > { %p241_p9 = pnand %p1142_p7, %p240_p8 }
   0xd   : > { %p272_p10 = scmp.lt.s32.totalorder (!%p241_p9), %s1560_s28, 1  ;;  %s1495_s22 = smov (!%p241_p9), 32  }
   0xe   : > { %244 = sbr.rel (%p241_p9) target bundleno = 719 (0x2cf), region = 48  ;;  %s1496_s13 = smov (!%p241_p9), 64  }
   0xf   : > { %s1332_s15 = sshll.u32 (!%p241_p9), %s1560_s28, 6  ;;  %s1451_s8 = scalar_lea.hbm (!%p241_p9), %s1993_s7, 128 }
  0x10   : > { %s1073_s18 = scalar_lea.hbm (!%p241_p9), %s1993_s7, %s1332_s15 }
  0x11   : > { %s1076_s20 = sshll.u32 (!%p241_p9), %s1073_s18, 4  ;;  %s1077_s20 = int_to_ptr.hbm [resolvable:$true] %s1076_s20 }
  0x13   : > { %v1311_v0 = vld [vmem:[%s1987_s1 + $0x38] sm:$0xff]  ;;  %v1310_v1 = vld [vmem:[%s1987_s1 + $0x30] sm:$0xff]  ;;  %v1309_v2 = vld [vmem:[%s1987_s1 + $0x28] sm:$0xff]  ;;  %s273_s23 = scalar_select %p272_p10, %s1560_s28, 1  ;;  %v395_v20 = vlaneseq  ;;  %vm516_vm0 = vcmask 1040384   ;;  %vm573_vm7 = vcmask 1046528  }
  0x14   : > { %358 = vmatpush.bf16.msra.mxu0 %v1311_v0  ;;  %v1308_v3 = vld [vmem:[%s1987_s1 + $0x20] sm:$0xff]  ;;  %v1307_v4 = vld [vmem:[%s1987_s1 + $0x18] sm:$0xff]  ;;  %v1306_v5 = vld [vmem:[%s1987_s1 + $0x10] sm:$0xff]  ;;  %s1445_s28 = sshra.s32 %s1077_s20, 4  ;;  %s1446_s28 = int_to_ptr.hbm [resolvable:$true] %s1445_s28 }
  0x15   : > { %s1303_s9 = sshll.u32 %s273_s23, 6  ;;  %v1305_v6 = vld [vmem:[%s1987_s1 + $0x8] sm:$0xff]  ;;  %v1304_v7 = vld [vmem:[%s1987_s1] sm:$0xff]  ;;  %v1645_v22 = vshrl.u32 %v395_v20, 7  ;;  %p1452_p0 = scmp.lt.s32.totalorder %s1446_s28, %s1993_s7 }
  0x16   : > { %s276_s17 = scalar_lea.vmem %s1986_s0, %s1303_s9  ;;  %v1643_v21 = vld [vmem:[%s1990_s4] ss:$0 sm:$0xff]  ;;  %s269_s9 = sand.u32 1, %s1485_s25  }
  0x17   : > { %v1616_v8 = vld [vmem:[%s276_s17] sm:$0xff]  ;;  %v1618_v9 = vld [vmem:[%s276_s17 + $0x8] sm:$0xff]  ;;  %v1622_v11 = vld [vmem:[%s276_s17 + $0x10] sm:$0xff]  ;;  %v408_v25 = vand.u32 7, %v1645_v22  ;;  %v1653_v28 = vadd.s32 8, %v1645_v22  ;;  %v398_v37 = vadd.s32 16, %v1645_v22 }
  0x18   : > { %359 = vmatpush.bf16.msra.mxu0 %v1310_v1  ;;  %v286_v10 = vpack.c.bf16 %v1618_v9, %v1616_v8  ;;  %v1624_v12 = vld [vmem:[%s276_s17 + $0x18] sm:$0xff]  ;;  %v1628_v14 = vld [vmem:[%s276_s17 + $0x20] sm:$0xff]  ;;  %v1630_v15 = vld [vmem:[%s276_s17 + $0x28] sm:$0xff]  ;;  %v399_v46 = vadd.s32 24, %v1645_v22  ;;  %v400_v54 = vadd.s32 32, %v1645_v22  ;;  %s1062_s21 = scalar_lea.sflag [#allocation3], %s269_s9 }
  0x19   : > { %v287_v13 = vpack.c.bf16 %v1624_v12, %v1622_v11  ;;  %v288_v16 = vpack.c.bf16 %v1630_v15, %v1628_v14  ;;  %v1634_v17 = vld [vmem:[%s276_s17 + $0x30] sm:$0xff]  ;;  %v1636_v18 = vld [vmem:[%s276_s17 + $0x38] sm:$0xff]  ;;  %vm1657_vm1 = vcmp.ge.s32.totalorder %v408_v25, 1  ;;  %v415_v34 = vand.u32 7, %v1653_v28 }
  0x1a   : > { %v289_v19 = vpack.c.bf16 %v1636_v18, %v1634_v17  ;;  %v422_v43 = vand.u32 7, %v398_v37  ;;  %v429_v52 = vand.u32 7, %v399_v46  ;;  %v436_v60 = vand.u32 7, %v400_v54 }
  0x1b   : > { %vm1675_vm2 = vcmp.ge.s32.totalorder %v415_v34, 1  ;;  %vm1780_vm13 = vcmp.le.s32.totalorder %v415_v34, 6  ;;  %vm565_vm14 = vcmp.le.s32.totalorder %v408_v25, 6 }
  0x1c   : > { %360 = vmatpush.bf16.msra.mxu0 %v1309_v2  ;;  %vm1690_vm3 = vcmp.ge.s32.totalorder %v422_v43, 1  ;;  %vm1703_vm4 = vcmp.ge.s32.totalorder %v429_v52, 1  ;;  %vm1716_vm5 = vcmp.le.s32.totalorder %v422_v43, 6  ;;  %vm568_vm6 = vcmp.le.s32.totalorder %v429_v52, 6 }
  0x1d   : > { %vm1720_vm8 = vcmp.ge.s32.totalorder %v436_v60, 1  ;;  %vm569_vm10 = vcmp.le.s32.totalorder %v436_v60, 6  ;;  %v403_v2 = vadd.s32 56, %v1645_v22 }
  0x20   : > { %361 = vmatpush.bf16.msra.mxu0 %v1308_v3 }
  0x24   : > { %362 = vmatpush.bf16.msra.mxu0 %v1307_v4 }
  0x28   : > { %363 = vmatpush.bf16.msra.mxu0 %v1306_v5 }
  0x2c   : > { %364 = vmatpush.bf16.msra.mxu0 %v1305_v6 }
  0x30   : > { %365 = vmatpush.bf16.msra.mxu0 %v1304_v7  ;;  %v401_v7 = vadd.s32 40, %v1645_v22 }
  0x33   : > { %366 = vmatmul.bf16.vlgmr.msra.gmra.mxu0 %v286_v10 }
  0x43   : > { %371 = vmatmul.bf16.gmra.mxu0 %v287_v13  ;;  %v1317_v13 = vld [vmem:[%s1988_s2 + $0x28] sm:$0xff] }
  0x44   : > { %1333 = vmatpush.bf16.msra.mxu2 %v1317_v13  ;;  %1334 = vmatpush.bf16.msra.mxu3 %v1317_v13 }
  0x45   : > { %763 = vmatpush.bf16.msra.mxu1 %v1317_v13 }
  0x53   : > { %376 = vmatmul.bf16.gmra.mxu0 %v288_v16 }
  0x63   : > { %381 = vmatmul.bf16.gmra.mxu0 %v289_v19 }
  0xb0   : > { %v367_v23 = vpop.f32.mrf.mxu0 }
  0xb1   : > { %v368_v24 = vadd.f32 %v1643_v21, %v367_v23 }
  0xb3   : > { %v1649_v26 = vmax.f32 %v368_v24, 0.0 }
  0xb5   : > { %v517_v27 = vrot.slane %v1649_v26, 7 }
  0xb7   : > { %v1662_v30 = vsel %vm516_vm0, 0.0, %v517_v27 }
  0xb8   : > { %v369_v31 = vpop.f32.mrf.mxu0  ;;  %v557_v32 = vsel %vm1657_vm1, %v1662_v30, 0.0 }
  0xb9   : > { %v370_v33 = vadd.f32 %v1643_v21, %v369_v31 }
  0xbb   : > { %v1669_v35 = vmax.f32 %v370_v33, 0.0  ;;  %v443_v33 = vand.u32 7, %v401_v7 }
  0xbd   : > { %v518_v36 = vrot.slane %v1669_v35, 7  ;;  %vm1746_vm9 = vcmp.ge.s32.totalorder %v443_v33, 1  ;;  %vm570_vm11 = vcmp.le.s32.totalorder %v443_v33, 6  ;;  %v575_v7 = vrot.slane %v1669_v35, 1 }
  0xbf   : > { %v1680_v39 = vsel %vm516_vm0, %v517_v27, %v518_v36 }
  0xc0   : > { %v372_v40 = vpop.f32.mrf.mxu0  ;;  %v558_v41 = vsel %vm1675_vm2, %v1680_v39, 0.0  ;;  %v1331_v39 = vld [vmem:[%s1989_s3 + $0x8] sm:$0xff] }
  0xc1   : > { %v373_v42 = vadd.f32 %v1643_v21, %v372_v40  ;;  %v402_v40 = vadd.s32 48, %v1645_v22 }
  0xc3   : > { %v1686_v44 = vmax.f32 %v373_v42, 0.0 }
  0xc5   : > { %v520_v45 = vrot.slane %v1686_v44, 7  ;;  %v577_v0 = vrot.slane %v1686_v44, 1 }
  0xc7   : > { %v1695_v48 = vsel %vm516_vm0, %v518_v36, %v520_v45  ;;  %v1316_v36 = vld [vmem:[%s1988_s2 + $0x20] sm:$0xff]  ;;  %v578_v33 = vsel %vm573_vm7, %v575_v7, %v577_v0 }
  0xc8   : > { %v374_v49 = vpop.f32.mrf.mxu0  ;;  %v559_v50 = vsel %vm1690_vm3, %v1695_v48, 0.0  ;;  %1335 = vmatpush.bf16.msra.mxu2 %v1316_v36  ;;  %1336 = vmatpush.bf16.msra.mxu3 %v1316_v36  ;;  %v615_v28 = vsel %vm1780_vm13, %v578_v33, 0.0  ;;  %v1324_v33 = vld [vmem:[%s1988_s2 + $0x60] sm:$0xff] }
  0xc9   : > { %v375_v51 = vadd.f32 %v1643_v21, %v374_v49  ;;  %764 = vmatpush.bf16.msra.mxu1 %v1316_v36 }
  0xcb   : > { %v390_v53 = vmax.f32 %v375_v51, 0.0  ;;  %v450_v51 = vand.u32 7, %v402_v40 }
  0xcd   : > { %v522_v55 = vrot.slane %v390_v53, 7  ;;  %v1388_v56 = vpack.i.bf16 %v390_v53, %v1686_v44  ;;  %v579_v62 = vrot.slane %v390_v53, 1  ;;  %vm1761_vm12 = vcmp.ge.s32.totalorder %v450_v51, 1 }
  0xcf   : > { %1389 = vrot.lane.b32.xlu0 %v1388_v56, %s1495_s22  ;;  %v1709_v58 = vsel %vm516_vm0, %v520_v45, %v522_v55  ;;  %v580_v6 = vsel %vm573_vm7, %v577_v0, %v579_v62 }
  0xd0   : > { %v377_v59 = vpop.f32.mrf.mxu0  ;;  %v560_v61 = vsel %vm1703_vm4, %v1709_v58, 0.0  ;;  %v616_v20 = vsel %vm1716_vm5, %v580_v6, 0.0  ;;  %vm571_vm5 = vcmp.le.s32.totalorder %v450_v51, 6 }
  0xd1   : > { %v378_v63 = vadd.f32 %v1643_v21, %v377_v59 }
  0xd3   : > { %v391_v1 = vmax.f32 %v378_v63, 0.0 }
  0xd5   : > { %v524_v4 = vrot.slane %v391_v1, 7  ;;  %v581_v5 = vrot.slane %v391_v1, 1 }
  0xd7   : > { %v582_v10 = vsel %vm573_vm7, %v579_v62, %v581_v5  ;;  %v1733_v16 = vsel %vm516_vm0, %v522_v55, %v524_v4  ;;  %v1418_v55 = vpack.i.bf16 %v1669_v35, %v1649_v26 }
  0xd8   : > { %v379_v19 = vpop.f32.mrf.mxu0  ;;  %v617_v23 = vsel %vm568_vm6, %v582_v10, 0.0  ;;  %v561_v24 = vsel %vm1720_vm8, %v1733_v16, 0.0 }
  0xd9   : > { %v380_v27 = vadd.f32 %v1643_v21, %v379_v19  ;;  %v1393_v31 = vpack.i.bf16 %v617_v23, %v616_v20 }
  0xdb   : > { %v392_v37 = vmax.f32 %v380_v27, 0.0  ;;  %1394 = vrot.lane.b32.xlu0 %v1393_v31, %s1496_s13  ;;  %v574_v27 = vrot.slane %v1649_v26, 1 }
  0xdd   : > { %v526_v42 = vrot.slane %v392_v37, 7  ;;  %v1398_v43 = vpack.i.bf16 %v392_v37, %v391_v1  ;;  %v583_v53 = vrot.slane %v392_v37, 1 }
  0xdf   : > { %1399 = vrot.lane.b32.xlu1 %v1398_v43, %s1495_s22  ;;  %v1752_v46 = vsel %vm516_vm0, %v524_v4, %v526_v42  ;;  %v584_v1 = vsel %vm573_vm7, %v581_v5, %v583_v53  ;;  %v457_v5 = vand.u32 7, %v403_v2  ;;  %v1328_v2 = vld [vmem:[%s1988_s2 + $0x80] sm:$0xff] }
  0xe0   : > { %v382_v49 = vpop.f32.mrf.mxu0  ;;  %v562_v52 = vsel %vm1746_vm9, %v1752_v46, 0.0  ;;  %v618_v60 = vsel %vm569_vm10, %v584_v1, 0.0  ;;  %v1322_v1 = vld [vmem:[%s1988_s2 + $0x50] sm:$0xff]  ;;  %vm748_vm10 = vcmask 785408  }
  0xe1   : > { %v383_v54 = vadd.f32 %v1643_v21, %v382_v49  ;;  %vm1790_vm15 = vcmp.ge.s32.totalorder %v457_v5, 1  ;;  %vm572_vm6 = vcmp.le.s32.totalorder %v457_v5, 6  ;;  %v1325_v5 = vld [vmem:[%s1988_s2 + $0x68] sm:$0xff] }
  0xe3   : > { %v393_v56 = vmax.f32 %v383_v54, 0.0  ;;  %1419 = vrot.lane.b32.xlu0 %v1418_v55, %s1495_s22  ;;  %v1314_v54 = vld [vmem:[%s1988_s2 + $0x10] sm:$0xff]  ;;  %v1313_v55 = vld [vmem:[%s1988_s2 + $0x8] sm:$0xff] }
  0xe5   : > { %v528_v62 = vrot.slane %v393_v56, 7  ;;  %v585_v63 = vrot.slane %v393_v56, 1 }
  0xe7   : > { %v586_v4 = vsel %vm573_vm7, %v583_v53, %v585_v63  ;;  %v1769_v6 = vsel %vm516_vm0, %v526_v42, %v528_v62  ;;  %v1315_v53 = vld [vmem:[%s1988_s2 + $0x18] sm:$0xff] }
  0xe8   : > { %v384_v10 = vpop.f32.mrf.mxu0  ;;  %v619_v13 = vsel %vm570_vm11, %v586_v4, 0.0  ;;  %v563_v19 = vsel %vm1761_vm12, %v1769_v6, 0.0  ;;  %1337 = vmatpush.bf16.msra.mxu2 %v1315_v53  ;;  %1338 = vmatpush.bf16.msra.mxu3 %v1315_v53  ;;  %v1321_v4 = vld [vmem:[%s1988_s2 + $0x48] sm:$0xff] }
  0xe9   : > { %v385_v20 = vadd.f32 %v1643_v21, %v384_v10  ;;  %v1403_v23 = vpack.i.bf16 %v619_v13, %v618_v60  ;;  %v576_v21 = vsel %vm573_vm7, %v574_v27, %v575_v7  ;;  %765 = vmatpush.bf16.msra.mxu1 %v1315_v53  ;;  %v1327_v7 = vld [vmem:[%s1988_s2 + $0x78] sm:$0xff]  ;;  %v1320_v10 = vld [vmem:[%s1988_s2 + $0x40] sm:$0xff]  ;;  %v1326_v13 = vld [vmem:[%s1988_s2 + $0x70] sm:$0xff] }
  0xea   : > { %v614_v44 = vsel %vm565_vm14, %v576_v21, 0.0  ;;  %v1319_v60 = vld [vmem:[%s1988_s2 + $0x38] sm:$0xff] }
  0xeb   : > { %v394_v31 = vmax.f32 %v385_v20, 0.0  ;;  %1404 = vrot.lane.b32.xlu1 %v1403_v23, %s1496_s13  ;;  %v1423_v42 = vpack.i.bf16 %v615_v28, %v614_v44  ;;  %v1318_v23 = vld [vmem:[%s1988_s2 + $0x30] sm:$0xff] }
  0xec   : > { %1339 = vmatpush.bf16.msra.mxu2 %v1314_v54  ;;  %1340 = vmatpush.bf16.msra.mxu3 %v1314_v54 }
  0xed   : > { %v530_v36 = vrot.slane %v394_v31, 7  ;;  %v587_v26 = vrot.slane %v394_v31, 1  ;;  %v1408_v37 = vpack.i.bf16 %v394_v31, %v393_v56  ;;  %766 = vmatpush.bf16.msra.mxu1 %v1314_v54  ;;  %v1312_v56 = vld [vmem:[%s1988_s2] sm:$0xff] }
  0xef   : > { %1409 = vrot.lane.b32.xlu2 %v1408_v37, %s1495_s22  ;;  %v588_v34 = vsel %vm573_vm7, %v585_v63, %v587_v26  ;;  %v597_v22 = vsel %vm573_vm7, %v587_v26, 0.0  ;;  %v1800_v25 = vsel %vm516_vm0, %v528_v62, %v530_v36  ;;  %v1323_v62 = vld [vmem:[%s1988_s2 + $0x58] sm:$0xff]  ;;  %v1329_v63 = vld [vmem:[%s1988_s2 + $0x88] sm:$0xff]  ;;  %vm678_vm0 = vcmask 261120   ;;  %s1447_s22 = scalar_lea.hbm %s1446_s28, 64 }
  0xf0   : > { %v564_v0 = vsel %vm1790_vm15, %v1800_v25, 0.0  ;;  %v620_v43 = vsel %vm571_vm5, %v588_v34, 0.0  ;;  %v621_v49 = vsel %vm572_vm6, %v597_v22, 0.0  ;;  %1341 = vmatpush.bf16.msra.mxu2 %v1313_v55  ;;  %1342 = vmatpush.bf16.msra.mxu3 %v1313_v55  ;;  %vm687_vm7 = vcmask 523264   ;;  %p1448_p11 = scmp.ne.s32.totalorder %s1446_s28, %s1447_s22  ;;  %p1453_p1 = scmp.lt.s32.totalorder %s1451_s8, %s1447_s22 }
  0xf1   : > { %v1413_v51 = vpack.i.bf16 %v621_v49, %v620_v43  ;;  %767 = vmatpush.bf16.msra.mxu1 %v1313_v55 }
  0xf2   : > { %p1449_p12 = pnand %p1448_p11, %p1577_p5  ;;  %p1454_p2 = por %p1453_p1, %p1452_p0 }
  0xf3   : > { %1424 = vrot.lane.b32.xlu1 %v1423_v42, %s1496_s13 }
  0xf4   : > { %1343 = vmatpush.bf16.msra.mxu2 %v1312_v56  ;;  %1344 = vmatpush.bf16.msra.mxu3 %v1312_v56  ;;  %p1450_p13 = pneg %p1449_p12 }
  0xf5   : > { %768 = vmatpush.bf16.msra.mxu1 %v1312_v56 }
  0xf6   : > { %p1455_p3 = pnand %p1454_p2, %p1450_p13 }
  0xf7   : > { %1414 = vrot.lane.b32.xlu2 %v1413_v51, %s1496_s13  ;;  %s1143_s13 = sshll.u32 %s269_s9, 6 }
  0xf8   : > { %917 = vmatpush.bf16.msrb.mxu3 %v1323_v62  ;;  %853 = vmatpush.bf16.msrb.mxu2 %v1329_v63  ;;  %s1935_s14 = scalar_lea.vmem [#allocation2], %s1143_s13 }
  0xf9   : > { %1014 = vmatpush.bf16.msrb.mxu1 %v1331_v39  ;;  %s1074_s19 = sshll.u32 %s1935_s14, 4  ;;  %s1075_s19 = int_to_ptr.vmem [resolvable:$true] %s1074_s19 }
  0xfc   : > { %918 = vmatpush.bf16.msrb.mxu3 %v1322_v1  ;;  %854 = vmatpush.bf16.msrb.mxu2 %v1328_v2 }
 0x100   : > { %919 = vmatpush.bf16.msrb.mxu3 %v1321_v4  ;;  %855 = vmatpush.bf16.msrb.mxu2 %v1327_v7 }
 0x104   : > { %920 = vmatpush.bf16.msrb.mxu3 %v1320_v10  ;;  %856 = vmatpush.bf16.msrb.mxu2 %v1326_v13  ;;  %v1330_v10 = vld [vmem:[%s1989_s3] sm:$0xff] }
 0x105   : > { %1015 = vmatpush.bf16.msrb.mxu1 %v1330_v10  ;;  %v1430_v10 = vld [vmem:[%s1992_s6] ss:$0 sm:$0xff] }
 0x108   : > { %921 = vmatpush.bf16.msrb.mxu3 %v1319_v60  ;;  %857 = vmatpush.bf16.msrb.mxu2 %v1325_v5 }
 0x10c   : > { %922 = vmatpush.bf16.msrb.mxu3 %v1318_v23  ;;  %858 = vmatpush.bf16.msrb.mxu2 %v1324_v33 }
 0x141   : > { %v1390_v20 = vpop.permute.xlu0 %1389 }
 0x142   : > { %v1392_v31 = vunpack.i.h.bf16 %v1390_v20  ;;  %v1391_v35 = vunpack.i.l.bf16 %v1390_v20 }
 0x144   : > { %v681_v37 = vsel %vm678_vm0, %v559_v50, %v1391_v35  ;;  %v682_v28 = vsel %vm678_vm0, %v560_v61, %v1392_v31  ;;  %v1429_v35 = vld [vmem:[%s1991_s5] ss:$0 sm:$0xff] }
 0x149   : > { %v1410_v27 = vpop.permute.xlu2 %1409 }
 0x14a   : > { %v1412_v34 = vunpack.i.h.bf16 %v1410_v27  ;;  %v1411_v22 = vunpack.i.l.bf16 %v1410_v27 }
 0x14c   : > { %v685_v48 = vsel %vm678_vm0, %v563_v19, %v1411_v22  ;;  %v686_v50 = vsel %vm678_vm0, %v564_v0, %v1412_v34 }
 0x14d   : > { %v1395_v21 = vpop.permute.xlu0 %1394 }
 0x14e   : > { %v1397_v36 = vunpack.i.h.bf16 %v1395_v21  ;;  %v1396_v26 = vunpack.i.l.bf16 %v1395_v21 }
 0x150   : > { %v690_v44 = vsel %vm687_vm7, %v681_v37, %v1396_v26  ;;  %v691_v42 = vsel %vm687_vm7, %v682_v28, %v1397_v36 }
 0x151   : > { %v1415_v43 = vpop.permute.xlu2 %1414  ;;  %v697_v49 = vpack.c.bf16 %v691_v42, %v690_v44  ;;  %v1400_v61 = vpop.permute.xlu1 %1399 }
 0x152   : > { %v1417_v47 = vunpack.i.h.bf16 %v1415_v43  ;;  %v1416_v51 = vunpack.i.l.bf16 %v1415_v43  ;;  %v1402_v59 = vunpack.i.h.bf16 %v1400_v61  ;;  %v1401_v6 = vunpack.i.l.bf16 %v1400_v61 }
 0x153   : > { %1203 = vmatmul.msk.bf16.vlgmr.msra.gmra.mxu2 %vm748_vm10, %v697_v49 }
 0x154   : > { %v694_v57 = vsel %vm687_vm7, %v685_v48, %v1416_v51  ;;  %v695_v58 = vsel %vm687_vm7, %v686_v50, %v1417_v47  ;;  %v683_v40 = vsel %vm678_vm0, %v561_v24, %v1401_v6  ;;  %v684_v25 = vsel %vm678_vm0, %v562_v52, %v1402_v59 }
 0x155   : > { %v699_v53 = vpack.c.bf16 %v695_v58, %v694_v57  ;;  %v1420_v0 = vpop.permute.xlu0 %1419 }
 0x156   : > { %v1422_v1 = vunpack.i.h.bf16 %v1420_v0  ;;  %v1421_v2 = vunpack.i.l.bf16 %v1420_v0 }
 0x157   : > { %1205 = vmatmul.msk.bf16.vlgmr.msra.gmra.mxu3 %vm748_vm10, %v699_v53 }
 0x158   : > { %v679_v24 = vsel %vm678_vm0, %v557_v32, %v1421_v2  ;;  %v680_v45 = vsel %vm678_vm0, %v558_v41, %v1422_v1 }
 0x15d   : > { %v1405_v54 = vpop.permute.xlu1 %1404 }
 0x15e   : > { %v1407_v19 = vunpack.i.h.bf16 %v1405_v54  ;;  %v1406_v55 = vunpack.i.l.bf16 %v1405_v54 }
 0x160   : > { %v692_v56 = vsel %vm687_vm7, %v683_v40, %v1406_v55  ;;  %v693_v62 = vsel %vm687_vm7, %v684_v25, %v1407_v19 }
 0x161   : > { %v698_v63 = vpack.c.bf16 %v693_v62, %v692_v56 }
 0x163   : > { %1204 = vmatmul.msk.bf16.gmra.mxu2 %vm748_vm10, %v698_v63 }
 0x165   : > { %v1425_v3 = vpop.permute.xlu1 %1424 }
 0x166   : > { %v1427_v16 = vunpack.i.h.bf16 %v1425_v3  ;;  %v1426_v4 = vunpack.i.l.bf16 %v1425_v3 }
 0x168   : > { %v688_v46 = vsel %vm687_vm7, %v679_v24, %v1426_v4  ;;  %v689_v52 = vsel %vm687_vm7, %v680_v45, %v1427_v16 }
 0x169   : > { %v696_v7 = vpack.c.bf16 %v689_v52, %v688_v46 }
 0x16b   : > { %1202 = vmatmul.msk.bf16.vlgmr.msra.gmra.mxu1 %vm748_vm10, %v696_v7  ;;  %1282 = vmatmul.msk.bf16.vlgmr.msrb.gmra.mxu3 %vm748_vm10, %v696_v7 }
 0x173   : > { %1254 = vmatmul.msk.bf16.vlgmr.msrb.gmra.mxu2 %vm748_vm10, %v696_v7 }
 0x17b   : > { %1283 = vmatmul.msk.bf16.gmra.mxu3 %vm748_vm10, %v697_v49 }
 0x183   : > { %1255 = vmatmul.msk.bf16.gmra.mxu2 %vm748_vm10, %v697_v49 }
 0x18b   : > { %1284 = vmatmul.msk.bf16.gmra.mxu3 %vm748_vm10, %v698_v63 }
 0x193   : > { %1256 = vmatmul.msk.bf16.gmra.mxu2 %vm748_vm10, %v698_v63 }
 0x19b   : > { %1285 = vmatmul.msk.bf16.gmra.mxu3 %vm748_vm10, %v699_v53 }
 0x1a3   : > { %1257 = vmatmul.msk.bf16.gmra.mxu2 %vm748_vm10, %v699_v53 }
 0x1d6   : > { %v775_v29 = vpop.f32.mrf.mxu2 }
 0x1da   : > { %v785_v30 = vpop.f32.mrf.mxu3 }
 0x1de   : > { %v777_v32 = vpop.f32.mrf.mxu2 }
 0x1e2   : > { %v787_v38 = vpop.f32.mrf.mxu3 }
 0x1e6   : > { %v780_v41 = vpop.f32.mrf.mxu2 }
 0x1e8   : > { %v770_v33 = vpop.f32.mrf.mxu1 }
 0x1ee   : > { %v782_v60 = vpop.f32.mrf.mxu2  ;;  %v924_v13 = vpop.f32.mrf.mxu3 }
 0x1f0   : > { %v772_v49 = vpop.f32.mrf.mxu1 }
 0x1f6   : > { %v860_v20 = vpop.f32.mrf.mxu2  ;;  %v926_v23 = vpop.f32.mrf.mxu3 }
 0x1f7   : > { %v927_v21 = vadd.f32 %v926_v23, %v770_v33 }
 0x1fe   : > { %v861_v5 = vpop.f32.mrf.mxu2  ;;  %v929_v27 = vpop.f32.mrf.mxu3 }
 0x1ff   : > { %v944_v31 = vadd.f32 %v924_v13, %v861_v5  ;;  %v930_v47 = vadd.f32 %v929_v27, %v772_v49 }
 0x201   : > { %v956_v26 = vadd.f32 %v1429_v35, %v944_v31 }
 0x203   : > { %v964_v22 = vmax.f32 %v956_v26, 0.0 }
 0x206   : > { %v864_v36 = vpop.f32.mrf.mxu2  ;;  %v931_v28 = vpop.f32.mrf.mxu3 }
 0x207   : > { %v945_v37 = vadd.f32 %v927_v21, %v864_v36  ;;  %v932_v50 = vadd.f32 %v931_v28, %v775_v29 }
 0x209   : > { %v957_v34 = vadd.f32 %v1429_v35, %v945_v37 }
 0x20b   : > { %v965_v44 = vmax.f32 %v957_v34, 0.0 }
 0x20d   : > { %v972_v42 = vpack.c.bf16 %v965_v44, %v964_v22 }
 0x20e   : > { %v866_v43 = vpop.f32.mrf.mxu2  ;;  %v934_v51 = vpop.f32.mrf.mxu3 }
 0x20f   : > { %1294 = vmatmul.msk.bf16.vlgmr.msrb.gmra.mxu1 %vm678_vm0, %v972_v42  ;;  %v946_v48 = vadd.f32 %v930_v47, %v866_v43  ;;  %v935_v40 = vadd.f32 %v934_v51, %v777_v32 }
 0x211   : > { %v958_v58 = vadd.f32 %v1429_v35, %v946_v48 }
 0x213   : > { %v966_v59 = vmax.f32 %v958_v58, 0.0 }
 0x216   : > { %v869_v57 = vpop.f32.mrf.mxu2  ;;  %v936_v54 = vpop.f32.mrf.mxu3 }
 0x217   : > { %v947_v61 = vadd.f32 %v932_v50, %v869_v57  ;;  %v937_v0 = vadd.f32 %v936_v54, %v780_v41 }
 0x219   : > { %v959_v53 = vadd.f32 %v1429_v35, %v947_v61 }
 0x21b   : > { %v967_v6 = vmax.f32 %v959_v53, 0.0 }
 0x21d   : > { %v973_v19 = vpack.c.bf16 %v967_v6, %v966_v59 }
 0x21e   : > { %v871_v55 = vpop.f32.mrf.mxu2  ;;  %v939_v56 = vpop.f32.mrf.mxu3 }
 0x21f   : > { %1295 = vmatmul.msk.bf16.gmra.mxu1 %vm678_vm0, %v973_v19  ;;  %v948_v25 = vadd.f32 %v935_v40, %v871_v55  ;;  %v940_v45 = vadd.f32 %v939_v56, %v782_v60 }
 0x221   : > { %v960_v63 = vadd.f32 %v1429_v35, %v948_v25 }
 0x223   : > { %v968_v3 = vmax.f32 %v960_v63, 0.0 }
 0x226   : > { %v874_v62 = vpop.f32.mrf.mxu2  ;;  %v941_v46 = vpop.f32.mrf.mxu3 }
 0x227   : > { %v949_v1 = vadd.f32 %v937_v0, %v874_v62  ;;  %v942_v7 = vadd.f32 %v941_v46, %v785_v30 }
 0x229   : > { %v961_v2 = vadd.f32 %v1429_v35, %v949_v1  ;;  %v963_v32 = vadd.f32 %v1429_v35, %v942_v7 }
 0x22b   : > { %v969_v16 = vmax.f32 %v961_v2, 0.0  ;;  %v971_v39 = vmax.f32 %v963_v32, 0.0 }
 0x22d   : > { %v974_v4 = vpack.c.bf16 %v969_v16, %v968_v3 }
 0x22e   : > { %v876_v24 = vpop.f32.mrf.mxu2 }
 0x22f   : > { %1296 = vmatmul.msk.bf16.gmra.mxu1 %vm678_vm0, %v974_v4  ;;  %v950_v52 = vadd.f32 %v940_v45, %v876_v24 }
 0x231   : > { %v962_v29 = vadd.f32 %v1429_v35, %v950_v52 }
 0x233   : > { %v970_v38 = vmax.f32 %v962_v29, 0.0 }
 0x235   : > { %v975_v41 = vpack.c.bf16 %v971_v39, %v970_v38 }
 0x23f   : > { %1297 = vmatmul.msk.bf16.gmra.mxu1 %vm678_vm0, %v975_v41 }
 0x28c   : > { %v1017_v13 = vpop.f32.mrf.mxu1 }
 0x28d   : > { %v1018_v60 = vadd.f32 %v1430_v10, %v1017_v13 }
 0x28f   : > { %v1037_v20 = vadd.f32 %v1018_v60, %v1616_v8 }
 0x291   : > { %v1045_v23 = vmax.f32 %v1037_v20, 0.0 }
 0x293   : > { %1053 = vst [vmem:[%s1935_s14] sm:$0xff] %v1045_v23 }
 0x294   : > { %v1019_v30 = vpop.f32.mrf.mxu1 }
 0x295   : > { %v1020_v5 = vadd.f32 %v1430_v10, %v1019_v30 }
 0x297   : > { %v1038_v27 = vadd.f32 %v1020_v5, %v1618_v9 }
 0x299   : > { %v1046_v31 = vmax.f32 %v1038_v27, 0.0 }
 0x29b   : > { %1054 = vst [vmem:[%s1935_s14 + $0x8] sm:$0xff] %v1046_v31 }
 0x29c   : > { %v1022_v35 = vpop.f32.mrf.mxu1 }
 0x29d   : > { %v1023_v33 = vadd.f32 %v1430_v10, %v1022_v35 }
 0x29f   : > { %v1039_v21 = vadd.f32 %v1023_v33, %v1622_v11 }
 0x2a1   : > { %v1047_v8 = vmax.f32 %v1039_v21, 0.0 }
 0x2a3   : > { %1055 = vst [vmem:[%s1935_s14 + $0x10] sm:$0xff] %v1047_v8 }
 0x2a4   : > { %v1024_v36 = vpop.f32.mrf.mxu1 }
 0x2a5   : > { %v1025_v26 = vadd.f32 %v1430_v10, %v1024_v36 }
 0x2a7   : > { %v1040_v37 = vadd.f32 %v1025_v26, %v1624_v12 }
 0x2a9   : > { %v1048_v28 = vmax.f32 %v1040_v37, 0.0 }
 0x2ab   : > { %1056 = vst [vmem:[%s1935_s14 + $0x18] sm:$0xff] %v1048_v28 }
 0x2ac   : > { %v1027_v34 = vpop.f32.mrf.mxu1 }
 0x2ad   : > { %v1028_v9 = vadd.f32 %v1430_v10, %v1027_v34 }
 0x2af   : > { %v1041_v22 = vadd.f32 %v1028_v9, %v1628_v14 }
 0x2b1   : > { %v1049_v44 = vmax.f32 %v1041_v22, 0.0 }
 0x2b3   : > { %1057 = vst [vmem:[%s1935_s14 + $0x20] sm:$0xff] %v1049_v44 }
 0x2b4   : > { %v1029_v42 = vpop.f32.mrf.mxu1 }
 0x2b5   : > { %v1030_v11 = vadd.f32 %v1430_v10, %v1029_v42 }
 0x2b7   : > { %v1042_v43 = vadd.f32 %v1030_v11, %v1630_v15 }
 0x2b9   : > { %v1050_v49 = vmax.f32 %v1042_v43, 0.0 }
 0x2bb   : > { %1058 = vst [vmem:[%s1935_s14 + $0x28] sm:$0xff] %v1050_v49 }
 0x2bc   : > { %v1032_v47 = vpop.f32.mrf.mxu1 }
 0x2bd   : > { %v1033_v12 = vadd.f32 %v1430_v10, %v1032_v47 }
 0x2bf   : > { %v1043_v51 = vadd.f32 %v1033_v12, %v1634_v17 }
 0x2c1   : > { %v1051_v48 = vmax.f32 %v1043_v51, 0.0 }
 0x2c3   : > { %1059 = vst [vmem:[%s1935_s14 + $0x30] sm:$0xff] %v1051_v48 }
 0x2c4   : > { %v1034_v14 = vpop.f32.mrf.mxu1 }
 0x2c5   : > { %v1035_v50 = vadd.f32 %v1430_v10, %v1034_v14 }
 0x2c7   : > { %v1044_v15 = vadd.f32 %v1035_v50, %v1636_v18 }
 0x2c9   : > { %v1052_v57 = vmax.f32 %v1044_v15, 0.0 }
 0x2cb   : > { %1060 = vst [vmem:[%s1935_s14 + $0x38] sm:$0xff] %v1052_v57 }
 0x2cc   : > { %1458 = shalt.err (!%p1455_p3)
}
 0x2cd   : > { %s1497_s9 = smov 128   ;;  %s1498_s14 = smov 8  }
 0x2ce   : > { %1345 = dma.vmem_to_hbm [thread:$0]  (%p1577_p5), %s1075_s19, 1024, %s1077_s20, %s1062_s21, %s1497_s9, %s1497_s9, %s1498_s14  }
 0x2cf PF: > { %p1351_p4 = scmp.ge.s32.totalorder %s1493_s27, 2  ;;  %s1091_s16 = sand.u32 1, %s1481_s24  }
 0x2d0   : > { %s1092_s17 = scalar_lea.sflag [#allocation3], %s1091_s16 }
 0x2d1   : > { %p1348_p7 = pnand %p1351_p4, %p1581_p6 }
 0x2d3   : > { %p1349_p8 = pneg %p1348_p7 }
 0x2d5   : > { %1476 = dma.done.wait (%p1349_p8), %s1092_s17, 1024  }
 0x2d6   : > { %1478 = vsyncadd (%p1349_p8), %s1092_s17, 4294966272  ;;  %p17_p9 = scmp.ge.s32.totalorder %s1564_s30, 4   ;;  %s2016_s24 = smov %s1485_s25 }
 0x2d7   : > { %s2017_s25 = smov %s1489_s26  ;;  %s2018_s26 = smov %s1575_s10 }
 0x2d8   : > { %s2019_s27 = smov %s1564_s30  ;;  %19 = sbr.rel (!%p17_p9) target bundleno = 3 (0x3), region = 85 }
 0x2dd   :  { %1098 = vsyncpa [#allocation3], 1 }
 0x2de   :  { %1100 = vsyncpa [#allocation3 + $0x1], 1 }

</bundles_post_ra>
